<compile_context>
chip_gen: v7x
topology: tpu7x:2x2x1
jax: 0.10.0
libtpu: 0.0.40
codegen_flags: <defaults>
</compile_context>

<pallas_src>
import functools

import jax
import jax.numpy as jnp
from jax import lax
from jax.experimental import pallas as pl
from jax.experimental.pallas import tpu as pltpu


def _elman_rnn_kernel(x_ref, wih_t_ref, whh_t_ref, b_rnn_ref, wfc_t_ref,
                      bfc_ref, out_ref, hid_ref, hs_ref, *,
                      seq_len: int, batch_pad: int, apply_logsoftmax: bool):
    """Whole-sequence Elman RNN + fc (+ logsoftmax) in one grid-less invocation.

    All tensors are 2-D and sublane-aligned (second-to-last dim multiple of 8),
    so no in-kernel access crosses an (8,128) tile boundary.

    x_ref     : (T*BP, I)  bf16  time-major rows, batch padded to BP
    wih_t_ref : (I, H)     bf16  rnn.weight_ih_l0, pre-transposed
    whh_t_ref : (H, H)     bf16  rnn.weight_hh_l0, pre-transposed
    b_rnn_ref : (1, H)     f32   rnn.bias_ih_l0 + rnn.bias_hh_l0 (fused)
    wfc_t_ref : (H, O)     bf16  fc.weight, pre-transposed
    bfc_ref   : (1, O)     f32   fc.bias
    out_ref   : (T*BP, O)  f32   per-step fc output (optionally log-softmaxed)
    hid_ref   : (BP, H)    f32   final hidden state
    hs_ref    : (T*BP, H)  f32   scratch: input projection, then hidden states
    """
    H = whh_t_ref.shape[0]

    # ---- Stage 1 (off the serial chain): batched input projection.
    # Single single-pass bf16 MXU matmul, f32 accumulation, bias folded in.
    hs_ref[...] = (jnp.dot(x_ref[...], wih_t_ref[...],
                           preferred_element_type=jnp.float32)
                   + b_rnn_ref[...])

    # ---- Stage 2: serial recurrence — one (BP,H)x(H,H) bf16 matmul + relu per
    # step, fully unrolled (T is small).  h carried in f32; cast to bf16 only
    # for the MXU operand so the serial chain is a single MXU pass per step.
    whh_t = whh_t_ref[...]                                   # hoisted (bf16)

    def step(t, h):
        row = pl.multiple_of(t * batch_pad, batch_pad)       # aligned sublane start
        h_new = jnp.maximum(
            hs_ref[pl.ds(row, batch_pad), :]
            + jnp.dot(h.astype(jnp.bfloat16), whh_t,
                      preferred_element_type=jnp.float32),
            0.0)                                             # nonlinearity='relu'
        hs_ref[pl.ds(row, batch_pad), :] = h_new
        return h_new

    h_last = lax.fori_loop(0, seq_len, step,
                           jnp.zeros((batch_pad, H), jnp.float32),
                           unroll=True)   # cap unroll factor if T grows large
    hid_ref[...] = h_last

    # ---- Stage 3 (off the serial chain): batched fc (+ logsoftmax), bulk store.
    logits = (jnp.dot(hs_ref[...].astype(jnp.bfloat16), wfc_t_ref[...],
                      preferred_element_type=jnp.float32)
              + bfc_ref[...])                                # (T*BP, O)
    if apply_logsoftmax:                                     # static: output_size > 1
        m = jnp.max(logits, axis=-1, keepdims=True)
        lse = jnp.log(jnp.sum(jnp.exp(logits - m), axis=-1, keepdims=True)) + m
        logits = logits - lse
    out_ref[...] = logits


def elman_rnn_forward(x, wih, whh, bih, bhh, wfc, bfc):
    """x: (B, T, I) float32.  Returns (out (B*T, O), hidden (1, B, H))."""
    B, T, I = x.shape
    H = whh.shape[0]
    O = wfc.shape[0]
    BP = ((B + 7) // 8) * 8            # sublane-padded batch (>= 8, multiple of 8)

    # Layout plumbing done by XLA outside the kernel (free for the kernel):
    # batch_first (B,T,I) -> time-major, pad batch to BP, pre-flatten to 2-D.
    x_tbi = jnp.transpose(x, (1, 0, 2)).astype(jnp.float32)       # (T, B, I)
    x_pad = jnp.pad(x_tbi, ((0, 0), (0, BP - B), (0, 0)))         # (T, BP, I)
    x_flat = x_pad.reshape(T * BP, I).astype(jnp.bfloat16)        # (T*BP, I)

    wih_t = jnp.transpose(wih).astype(jnp.bfloat16)               # (I, H)
    whh_t = jnp.transpose(whh).astype(jnp.bfloat16)               # (H, H)
    wfc_t = jnp.transpose(wfc).astype(jnp.bfloat16)               # (H, O)
    b_rnn = (bih + bhh).reshape(1, H).astype(jnp.float32)         # fused RNN bias
    b_fc = bfc.reshape(1, O).astype(jnp.float32)

    kernel = functools.partial(_elman_rnn_kernel, seq_len=T, batch_pad=BP,
                               apply_logsoftmax=(O > 1))
    vmem = pl.BlockSpec(memory_space=pltpu.MemorySpace.VMEM)

    out_flat, hid = pl.pallas_call(
        kernel,
        out_shape=(jax.ShapeDtypeStruct((T * BP, O), jnp.float32),
                   jax.ShapeDtypeStruct((BP, H), jnp.float32)),
        in_specs=[vmem] * 6,
        out_specs=(vmem, vmem),
        scratch_shapes=[pltpu.VMEM((T * BP, H), jnp.float32)],
    )(x_flat, wih_t, whh_t, b_rnn, wfc_t, b_fc)

    # Glue (outside the kernel): drop batch padding and reorder
    # (T, B, O) -> (B, T, O) -> (B*T, O) to match PyTorch's
    # out.contiguous().view(-1, hidden_dim) row ordering.
    out = out_flat.reshape(T, BP, O)[:, :B, :]
    out = jnp.transpose(out, (1, 0, 2)).reshape(B * T, O)
    hidden = hid[:B].reshape(1, B, H)
    return out, hidden


def _reference_forward(x, wih, whh, bih, bhh, wfc, bfc):
    """Pure-JAX f32 reference mirroring the PyTorch module (relu, n_layers=1)."""
    B, T, _ = x.shape
    H = whh.shape[0]
    O = wfc.shape[0]
    h = jnp.zeros((B, H), jnp.float32)
    hs = []
    for t in range(T):
        h = jnp.maximum(x[:, t, :] @ wih.T + bih + h @ whh.T + bhh, 0.0)
        hs.append(h)
    out = jnp.stack(hs, axis=1).reshape(B * T, H)    # (B*T, H)
    out = out @ wfc.T + bfc                          # (B*T, O)
    if O > 1:
        out = jax.nn.log_softmax(out, axis=1)
    return out, h[None]


if __name__ == "__main__":
    # Small shapes consistent with the module's forward:
    # batch=2, seq=8, input_size=16, hidden_dim=32, output_size=8, n_layers=1.
    B, T, I, H, O = 2, 8, 16, 32, 8

    key = jax.random.PRNGKey(0)
    kx, k1, k2, k3, k4, k5, k6 = jax.random.split(key, 7)

    # Deterministic init mirroring PyTorch default U(-1/sqrt(H), 1/sqrt(H)).
    s = 1.0 / jnp.sqrt(jnp.float32(H))
    wih = jax.random.uniform(k1, (H, I), jnp.float32, -s, s)   # weight_ih_l0
    whh = jax.random.uniform(k2, (H, H), jnp.float32, -s, s)   # weight_hh_l0
    bih = jax.random.uniform(k3, (H,), jnp.float32, -s, s)     # bias_ih_l0
    bhh = jax.random.uniform(k4, (H,), jnp.float32, -s, s)     # bias_hh_l0
    wfc = jax.random.uniform(k5, (O, H), jnp.float32, -s, s)   # fc.weight
    bfc = jax.random.uniform(k6, (O,), jnp.float32, -s, s)     # fc.bias

    x = jax.random.normal(kx, (B, T, I), jnp.float32)

    out, hidden = jax.jit(elman_rnn_forward)(x, wih, whh, bih, bhh, wfc, bfc)
    out = jax.block_until_ready(out)
    hidden = jax.block_until_ready(hidden)

    assert out.shape == (B * T, O) and hidden.shape == (1, B, H)

    # bf16 MXU operands (f32 accumulation) => relaxed tolerance vs f32 reference.
    ref_out, ref_hidden = _reference_forward(x, wih, whh, bih, bhh, wfc, bfc)
    assert jnp.allclose(out, ref_out, atol=5e-2, rtol=5e-2)
    assert jnp.allclose(hidden, ref_hidden, atol=5e-2, rtol=5e-2)

    print("KERNEL_OK")
</pallas_src>

<mosaic_0001>
module attributes {stable_mosaic.version = 11 : i64} {
  func.func @_elman_rnn_kernel(%arg0: memref<64x16xbf16, #tpu.memory_space<vmem>>, %arg1: memref<16x32xbf16, #tpu.memory_space<vmem>>, %arg2: memref<32x32xbf16, #tpu.memory_space<vmem>>, %arg3: memref<1x32xf32, #tpu.memory_space<vmem>>, %arg4: memref<32x8xbf16, #tpu.memory_space<vmem>>, %arg5: memref<1x8xf32, #tpu.memory_space<vmem>>, %arg6: memref<64x8xf32, #tpu.memory_space<vmem>>, %arg7: memref<8x32xf32, #tpu.memory_space<vmem>>, %arg8: memref<64x32xf32, #tpu.memory_space<vmem>>) attributes {dimension_semantics = [], scalar_prefetch = 0 : i64, scratch_operands = 1 : i64, tpu.core_type = #tpu.core_type<tc>} {
    %c0 = arith.constant 0 : index
    %c0_0 = arith.constant 0 : index
    %0 = vector.load %arg0[%c0, %c0_0] : memref<64x16xbf16, #tpu.memory_space<vmem>>, vector<64x16xbf16>
    %c0_1 = arith.constant 0 : index
    %c0_2 = arith.constant 0 : index
    %1 = vector.load %arg1[%c0_1, %c0_2] : memref<16x32xbf16, #tpu.memory_space<vmem>>, vector<16x32xbf16>
    %cst = arith.constant dense<0.000000e+00> : vector<64x32xf32>
    %2 = tpu.matmul %0, %1, %cst {dimension_numbers = #tpu.dot_dimension_numbers<[1], [0], [0], [1], [0, 0, 1, 1], [], []>} : vector<64x16xbf16>, vector<16x32xbf16>, vector<64x32xf32> -> vector<64x32xf32>
    %c0_3 = arith.constant 0 : index
    %c0_4 = arith.constant 0 : index
    %3 = vector.load %arg3[%c0_3, %c0_4] : memref<1x32xf32, #tpu.memory_space<vmem>>, vector<1x32xf32>
    %4 = vector.broadcast %3 : vector<1x32xf32> to vector<64x32xf32>
    %5 = arith.addf %2, %4 : vector<64x32xf32>
    %c0_5 = arith.constant 0 : index
    %c0_6 = arith.constant 0 : index
    %6 = vector.load %arg8[%c0_5, %c0_6] : memref<64x32xf32, #tpu.memory_space<vmem>>, vector<64x32xf32>
    tpu.vector_store %arg8[%c0_5, %c0_6], %5 {strides = array<i32>} : memref<64x32xf32, #tpu.memory_space<vmem>>, vector<64x32xf32>,
    %c0_7 = arith.constant 0 : index
    %c0_8 = arith.constant 0 : index
    %7 = vector.load %arg2[%c0_7, %c0_8] : memref<32x32xbf16, #tpu.memory_space<vmem>>, vector<32x32xbf16>
    %cst_9 = arith.constant 0.000000e+00 : f32
    %8 = vector.broadcast %cst_9 : f32 to vector<8x32xf32>
    %c0_i32 = arith.constant 0 : i32
    %c8_i32 = arith.constant 8 : i32
    %9 = arith.muli %c0_i32, %c8_i32 : i32
    %10 = tpu.assume_multiple %9, 8 : i32
    %11 = arith.index_cast %10 : i32 to index
    %c0_10 = arith.constant 0 : index
    %12 = vector.load %arg8[%11, %c0_10] : memref<64x32xf32, #tpu.memory_space<vmem>>, vector<8x32xf32>
    %13 = arith.truncf %8 : vector<8x32xf32> to vector<8x32xbf16>
    %cst_11 = arith.constant dense<0.000000e+00> : vector<8x32xf32>
    %14 = tpu.matmul %13, %7, %cst_11 {dimension_numbers = #tpu.dot_dimension_numbers<[1], [0], [0], [1], [0, 0, 1, 1], [], []>} : vector<8x32xbf16>, vector<32x32xbf16>, vector<8x32xf32> -> vector<8x32xf32>
    %15 = arith.addf %12, %14 : vector<8x32xf32>
    %cst_12 = arith.constant 0.000000e+00 : f32
    %16 = vector.broadcast %cst_12 : f32 to vector<8x32xf32>
    %17 = arith.maximumf %15, %16 : vector<8x32xf32>
    %18 = arith.index_cast %10 : i32 to index
    %c0_13 = arith.constant 0 : index
    %19 = vector.load %arg8[%18, %c0_13] : memref<64x32xf32, #tpu.memory_space<vmem>>, vector<8x32xf32>
    tpu.vector_store %arg8[%18, %c0_13], %17 {strides = array<i32>} : memref<64x32xf32, #tpu.memory_space<vmem>>, vector<8x32xf32>,
    %c1_i32 = arith.constant 1 : i32
    %c8_i32_14 = arith.constant 8 : i32
    %20 = arith.muli %c1_i32, %c8_i32_14 : i32
    %21 = tpu.assume_multiple %20, 8 : i32
    %22 = arith.index_cast %21 : i32 to index
    %c0_15 = arith.constant 0 : index
    %23 = vector.load %arg8[%22, %c0_15] : memref<64x32xf32, #tpu.memory_space<vmem>>, vector<8x32xf32>
    %24 = arith.truncf %17 : vector<8x32xf32> to vector<8x32xbf16>
    %cst_16 = arith.constant dense<0.000000e+00> : vector<8x32xf32>
    %25 = tpu.matmul %24, %7, %cst_16 {dimension_numbers = #tpu.dot_dimension_numbers<[1], [0], [0], [1], [0, 0, 1, 1], [], []>} : vector<8x32xbf16>, vector<32x32xbf16>, vector<8x32xf32> -> vector<8x32xf32>
    %26 = arith.addf %23, %25 : vector<8x32xf32>
    %cst_17 = arith.constant 0.000000e+00 : f32
    %27 = vector.broadcast %cst_17 : f32 to vector<8x32xf32>
    %28 = arith.maximumf %26, %27 : vector<8x32xf32>
    %29 = arith.index_cast %21 : i32 to index
    %c0_18 = arith.constant 0 : index
    %30 = vector.load %arg8[%29, %c0_18] : memref<64x32xf32, #tpu.memory_space<vmem>>, vector<8x32xf32>
    tpu.vector_store %arg8[%29, %c0_18], %28 {strides = array<i32>} : memref<64x32xf32, #tpu.memory_space<vmem>>, vector<8x32xf32>,
    %c2_i32 = arith.constant 2 : i32
    %c8_i32_19 = arith.constant 8 : i32
    %31 = arith.muli %c2_i32, %c8_i32_19 : i32
    %32 = tpu.assume_multiple %31, 8 : i32
    %33 = arith.index_cast %32 : i32 to index
    %c0_20 = arith.constant 0 : index
    %34 = vector.load %arg8[%33, %c0_20] : memref<64x32xf32, #tpu.memory_space<vmem>>, vector<8x32xf32>
    %35 = arith.truncf %28 : vector<8x32xf32> to vector<8x32xbf16>
    %cst_21 = arith.constant dense<0.000000e+00> : vector<8x32xf32>
    %36 = tpu.matmul %35, %7, %cst_21 {dimension_numbers = #tpu.dot_dimension_numbers<[1], [0], [0], [1], [0, 0, 1, 1], [], []>} : vector<8x32xbf16>, vector<32x32xbf16>, vector<8x32xf32> -> vector<8x32xf32>
    %37 = arith.addf %34, %36 : vector<8x32xf32>
    %cst_22 = arith.constant 0.000000e+00 : f32
    %38 = vector.broadcast %cst_22 : f32 to vector<8x32xf32>
    %39 = arith.maximumf %37, %38 : vector<8x32xf32>
    %40 = arith.index_cast %32 : i32 to index
    %c0_23 = arith.constant 0 : index
    %41 = vector.load %arg8[%40, %c0_23] : memref<64x32xf32, #tpu.memory_space<vmem>>, vector<8x32xf32>
    tpu.vector_store %arg8[%40, %c0_23], %39 {strides = array<i32>} : memref<64x32xf32, #tpu.memory_space<vmem>>, vector<8x32xf32>,
    %c3_i32 = arith.constant 3 : i32
    %c8_i32_24 = arith.constant 8 : i32
    %42 = arith.muli %c3_i32, %c8_i32_24 : i32
    %43 = tpu.assume_multiple %42, 8 : i32
    %44 = arith.index_cast %43 : i32 to index
    %c0_25 = arith.constant 0 : index
    %45 = vector.load %arg8[%44, %c0_25] : memref<64x32xf32, #tpu.memory_space<vmem>>, vector<8x32xf32>
    %46 = arith.truncf %39 : vector<8x32xf32> to vector<8x32xbf16>
    %cst_26 = arith.constant dense<0.000000e+00> : vector<8x32xf32>
    %47 = tpu.matmul %46, %7, %cst_26 {dimension_numbers = #tpu.dot_dimension_numbers<[1], [0], [0], [1], [0, 0, 1, 1], [], []>} : vector<8x32xbf16>, vector<32x32xbf16>, vector<8x32xf32> -> vector<8x32xf32>
    %48 = arith.addf %45, %47 : vector<8x32xf32>
    %cst_27 = arith.constant 0.000000e+00 : f32
    %49 = vector.broadcast %cst_27 : f32 to vector<8x32xf32>
    %50 = arith.maximumf %48, %49 : vector<8x32xf32>
    %51 = arith.index_cast %43 : i32 to index
    %c0_28 = arith.constant 0 : index
    %52 = vector.load %arg8[%51, %c0_28] : memref<64x32xf32, #tpu.memory_space<vmem>>, vector<8x32xf32>
    tpu.vector_store %arg8[%51, %c0_28], %50 {strides = array<i32>} : memref<64x32xf32, #tpu.memory_space<vmem>>, vector<8x32xf32>,
    %c4_i32 = arith.constant 4 : i32
    %c8_i32_29 = arith.constant 8 : i32
    %53 = arith.muli %c4_i32, %c8_i32_29 : i32
    %54 = tpu.assume_multiple %53, 8 : i32
    %55 = arith.index_cast %54 : i32 to index
    %c0_30 = arith.constant 0 : index
    %56 = vector.load %arg8[%55, %c0_30] : memref<64x32xf32, #tpu.memory_space<vmem>>, vector<8x32xf32>
    %57 = arith.truncf %50 : vector<8x32xf32> to vector<8x32xbf16>
    %cst_31 = arith.constant dense<0.000000e+00> : vector<8x32xf32>
    %58 = tpu.matmul %57, %7, %cst_31 {dimension_numbers = #tpu.dot_dimension_numbers<[1], [0], [0], [1], [0, 0, 1, 1], [], []>} : vector<8x32xbf16>, vector<32x32xbf16>, vector<8x32xf32> -> vector<8x32xf32>
    %59 = arith.addf %56, %58 : vector<8x32xf32>
    %cst_32 = arith.constant 0.000000e+00 : f32
    %60 = vector.broadcast %cst_32 : f32 to vector<8x32xf32>
    %61 = arith.maximumf %59, %60 : vector<8x32xf32>
    %62 = arith.index_cast %54 : i32 to index
    %c0_33 = arith.constant 0 : index
    %63 = vector.load %arg8[%62, %c0_33] : memref<64x32xf32, #tpu.memory_space<vmem>>, vector<8x32xf32>
    tpu.vector_store %arg8[%62, %c0_33], %61 {strides = array<i32>} : memref<64x32xf32, #tpu.memory_space<vmem>>, vector<8x32xf32>,
    %c5_i32 = arith.constant 5 : i32
    %c8_i32_34 = arith.constant 8 : i32
    %64 = arith.muli %c5_i32, %c8_i32_34 : i32
    %65 = tpu.assume_multiple %64, 8 : i32
    %66 = arith.index_cast %65 : i32 to index
    %c0_35 = arith.constant 0 : index
    %67 = vector.load %arg8[%66, %c0_35] : memref<64x32xf32, #tpu.memory_space<vmem>>, vector<8x32xf32>
    %68 = arith.truncf %61 : vector<8x32xf32> to vector<8x32xbf16>
    %cst_36 = arith.constant dense<0.000000e+00> : vector<8x32xf32>
    %69 = tpu.matmul %68, %7, %cst_36 {dimension_numbers = #tpu.dot_dimension_numbers<[1], [0], [0], [1], [0, 0, 1, 1], [], []>} : vector<8x32xbf16>, vector<32x32xbf16>, vector<8x32xf32> -> vector<8x32xf32>
    %70 = arith.addf %67, %69 : vector<8x32xf32>
    %cst_37 = arith.constant 0.000000e+00 : f32
    %71 = vector.broadcast %cst_37 : f32 to vector<8x32xf32>
    %72 = arith.maximumf %70, %71 : vector<8x32xf32>
    %73 = arith.index_cast %65 : i32 to index
    %c0_38 = arith.constant 0 : index
    %74 = vector.load %arg8[%73, %c0_38] : memref<64x32xf32, #tpu.memory_space<vmem>>, vector<8x32xf32>
    tpu.vector_store %arg8[%73, %c0_38], %72 {strides = array<i32>} : memref<64x32xf32, #tpu.memory_space<vmem>>, vector<8x32xf32>,
    %c6_i32 = arith.constant 6 : i32
    %c8_i32_39 = arith.constant 8 : i32
    %75 = arith.muli %c6_i32, %c8_i32_39 : i32
    %76 = tpu.assume_multiple %75, 8 : i32
    %77 = arith.index_cast %76 : i32 to index
    %c0_40 = arith.constant 0 : index
    %78 = vector.load %arg8[%77, %c0_40] : memref<64x32xf32, #tpu.memory_space<vmem>>, vector<8x32xf32>
    %79 = arith.truncf %72 : vector<8x32xf32> to vector<8x32xbf16>
    %cst_41 = arith.constant dense<0.000000e+00> : vector<8x32xf32>
    %80 = tpu.matmul %79, %7, %cst_41 {dimension_numbers = #tpu.dot_dimension_numbers<[1], [0], [0], [1], [0, 0, 1, 1], [], []>} : vector<8x32xbf16>, vector<32x32xbf16>, vector<8x32xf32> -> vector<8x32xf32>
    %81 = arith.addf %78, %80 : vector<8x32xf32>
    %cst_42 = arith.constant 0.000000e+00 : f32
    %82 = vector.broadcast %cst_42 : f32 to vector<8x32xf32>
    %83 = arith.maximumf %81, %82 : vector<8x32xf32>
    %84 = arith.index_cast %76 : i32 to index
    %c0_43 = arith.constant 0 : index
    %85 = vector.load %arg8[%84, %c0_43] : memref<64x32xf32, #tpu.memory_space<vmem>>, vector<8x32xf32>
    tpu.vector_store %arg8[%84, %c0_43], %83 {strides = array<i32>} : memref<64x32xf32, #tpu.memory_space<vmem>>, vector<8x32xf32>,
    %c7_i32 = arith.constant 7 : i32
    %c8_i32_44 = arith.constant 8 : i32
    %86 = arith.muli %c7_i32, %c8_i32_44 : i32
    %87 = tpu.assume_multiple %86, 8 : i32
    %88 = arith.index_cast %87 : i32 to index
    %c0_45 = arith.constant 0 : index
    %89 = vector.load %arg8[%88, %c0_45] : memref<64x32xf32, #tpu.memory_space<vmem>>, vector<8x32xf32>
    %90 = arith.truncf %83 : vector<8x32xf32> to vector<8x32xbf16>
    %cst_46 = arith.constant dense<0.000000e+00> : vector<8x32xf32>
    %91 = tpu.matmul %90, %7, %cst_46 {dimension_numbers = #tpu.dot_dimension_numbers<[1], [0], [0], [1], [0, 0, 1, 1], [], []>} : vector<8x32xbf16>, vector<32x32xbf16>, vector<8x32xf32> -> vector<8x32xf32>
    %92 = arith.addf %89, %91 : vector<8x32xf32>
    %cst_47 = arith.constant 0.000000e+00 : f32
    %93 = vector.broadcast %cst_47 : f32 to vector<8x32xf32>
    %94 = arith.maximumf %92, %93 : vector<8x32xf32>
    %95 = arith.index_cast %87 : i32 to index
    %c0_48 = arith.constant 0 : index
    %96 = vector.load %arg8[%95, %c0_48] : memref<64x32xf32, #tpu.memory_space<vmem>>, vector<8x32xf32>
    tpu.vector_store %arg8[%95, %c0_48], %94 {strides = array<i32>} : memref<64x32xf32, #tpu.memory_space<vmem>>, vector<8x32xf32>,
    %c8_i32_49 = arith.constant 8 : i32
    %c0_50 = arith.constant 0 : index
    %c0_51 = arith.constant 0 : index
    %97 = vector.load %arg7[%c0_50, %c0_51] : memref<8x32xf32, #tpu.memory_space<vmem>>, vector<8x32xf32>
    tpu.vector_store %arg7[%c0_50, %c0_51], %94 {strides = array<i32>} : memref<8x32xf32, #tpu.memory_space<vmem>>, vector<8x32xf32>,
    %c0_52 = arith.constant 0 : index
    %c0_53 = arith.constant 0 : index
    %98 = vector.load %arg8[%c0_52, %c0_53] : memref<64x32xf32, #tpu.memory_space<vmem>>, vector<64x32xf32>
    %99 = arith.truncf %98 : vector<64x32xf32> to vector<64x32xbf16>
    %c0_54 = arith.constant 0 : index
    %c0_55 = arith.constant 0 : index
    %100 = vector.load %arg4[%c0_54, %c0_55] : memref<32x8xbf16, #tpu.memory_space<vmem>>, vector<32x8xbf16>
    %cst_56 = arith.constant dense<0.000000e+00> : vector<64x8xf32>
    %101 = tpu.matmul %99, %100, %cst_56 {dimension_numbers = #tpu.dot_dimension_numbers<[1], [0], [0], [1], [0, 0, 1, 1], [], []>} : vector<64x32xbf16>, vector<32x8xbf16>, vector<64x8xf32> -> vector<64x8xf32>
    %c0_57 = arith.constant 0 : index
    %c0_58 = arith.constant 0 : index
    %102 = vector.load %arg5[%c0_57, %c0_58] : memref<1x8xf32, #tpu.memory_space<vmem>>, vector<1x8xf32>
    %103 = vector.broadcast %102 : vector<1x8xf32> to vector<64x8xf32>
    %104 = arith.addf %101, %103 : vector<64x8xf32>
    %cst_59 = arith.constant dense<0xFF800000> : vector<64xf32>
    %105 = vector.multi_reduction <maximumf>, %104, %cst_59 [1] : vector<64x8xf32> to vector<64xf32>
    %106 = vector.shape_cast %105 : vector<64xf32> to vector<64x1xf32>
    %107 = vector.broadcast %106 : vector<64x1xf32> to vector<64x8xf32>
    %108 = arith.subf %104, %107 : vector<64x8xf32>
    %109 = math.exp %108 : vector<64x8xf32>
    %cst_60 = arith.constant dense<0.000000e+00> : vector<64xf32>
    %110 = vector.multi_reduction <add>, %109, %cst_60 [1] : vector<64x8xf32> to vector<64xf32>
    %111 = vector.shape_cast %110 : vector<64xf32> to vector<64x1xf32>
    %112 = math.log %111 : vector<64x1xf32>
    %113 = arith.addf %112, %106 : vector<64x1xf32>
    %114 = vector.broadcast %113 : vector<64x1xf32> to vector<64x8xf32>
    %115 = arith.subf %104, %114 : vector<64x8xf32>
    %c0_61 = arith.constant 0 : index
    %c0_62 = arith.constant 0 : index
    %116 = vector.load %arg6[%c0_61, %c0_62] : memref<64x8xf32, #tpu.memory_space<vmem>>, vector<64x8xf32>
    tpu.vector_store %arg6[%c0_61, %c0_62], %115 {strides = array<i32>} : memref<64x8xf32, #tpu.memory_space<vmem>>, vector<64x8xf32>,
    return
  }
}

</mosaic_0001>

<bundles_post_ra>
// kernel: elman_rnn_forward.1
= control target key start
LH: loop header
LB: loop body
LE: loop exit
PB: predicated region body
PF: predicated region fallthrough
CT: control target
= control target key end

     0   :  { %vm69_vm0 = vcmask 130048   ;;  %v989_v5 = vmov 0.0   ;;  %vm990_vm1 = vmmov 0   ;;  %v991_v8 = vmov 0   ;;  %s1272_s1 = inlined_call_operand.vmem [shape: bf16[16,32], index: 1, kind: input, shape index: {}]   ;;  %s1273_s0 = inlined_call_operand.vmem [shape: bf16[64,16], index: 0, kind: input, shape index: {}]   ;;  %s1274_s2 = inlined_call_operand.vmem [shape: bf16[32,32], index: 2, kind: input, shape index: {}]   ;;  %s1275_s3 = inlined_call_operand.vmem [shape: f32[1,32], index: 3, kind: input, shape index: {}]   ;;  %s1276_s4 = inlined_call_operand.vmem [shape: bf16[32,8], index: 4, kind: input, shape index: {}]   ;;  %s1277_s5 = inlined_call_operand.vmem [shape: f32[1,8], index: 5, kind: input, shape index: {}]   ;;  %s1278_s7 = inlined_call_operand.vmem [shape: f32[8,32], index: 7, kind: output, shape index: {1}]   ;;  %s1279_s6 = inlined_call_operand.vmem [shape: f32[64,8], index: 6, kind: output, shape index: {0}]  }
   0x1   :  { %v948_v0 = vld [vmem:[%s1272_s1] sm:$0xff]   ;;  %v950_v2 = vld [vmem:[%s1273_s0 + $0x10] sm:$0xff]   ;;  %v951_v3 = vld [vmem:[%s1273_s0 + $0x8] sm:$0xff]   ;;  %vm147_vm2 = vcmask 261120   ;;  %vm675_vm3 = vcmask 64512  }
   0x2   :  { %v949_v1 = vld [vmem:[%s1273_s0] sm:$0xff]   ;;  %857 = vmatprep.subr.bf16.mxu0 %v948_v0  ;;  %943 = vmatprep.subr.bf16.mxu1 %v948_v0  ;;  %v952_v4 = vld [vmem:[%s1273_s0 + $0x18] sm:$0xff]   ;;  %v1062_v7 = vld [vmem:[%s1274_s2 + $0x8] sm:$0xff]  }
   0x3   :  { %858 = vmatpush3.bf16.msra.mxu0 %v948_v0  ;;  %944 = vmatpush3.bf16.msra.mxu1 %v948_v0  ;;  %v1053_v6 = vld [vmem:[%s1274_s2] sm:$0xff]  }
   0x4   :  { %859 = vmatprep.mubr.msk.bf16.mxu0 %vm69_vm0, %v949_v1  ;;  %863 = vmatprep.mubr.msk.bf16.mxu1 %vm69_vm0, %v950_v2  ;;  %v796_v9 = vld [vmem:[%s1275_s3] ss:$0 sm:$0xff] }
   0x5   :  { %867 = vmatprep.subr.bf16.mxu1 %v989_v5  ;;  %883 = vmatprep.subr.bf16.mxu0 %v989_v5  ;;  %v955_v2 = vld [vmem:[%s1276_s4] sm:$0xff]  }
   0x6   :  { %860 = vmatmul.mubr.msk.bf16.vlgmr.msra.gmra.mrb[0].mxu0 %vm69_vm0, %v951_v3  ;;  %864 = vmatmul.mubr.msk.bf16.vlgmr.msra.gmra.mrb[0].mxu1 %vm69_vm0, %v952_v4 }
   0x7   :  { %868 = vmatpush3.bf16.msra.mxu1 %v1053_v6  ;;  %871 = vmatprep.mubr.msk.bf16.mxu1 %vm990_vm1, %v989_v5 }
   0x8   :  { %869 = vmatprep.subr.bf16.mxu1 %v989_v5  ;;  %884 = vmatpush3.bf16.msra.mxu0 %v1053_v6 }
   0x9   :  { %885 = vmatprep.subr.bf16.mxu0 %v989_v5  ;;  %887 = vmatprep.mubr.msk.bf16.mxu0 %vm990_vm1, %v989_v5 }
   0xb   :  { %870 = vmatpush3.bf16.msra.mxu1 %v1062_v7 }
   0xc   :  { %875 = vmatprep.subr.bf16.mxu1 %v989_v5  ;;  %886 = vmatpush3.bf16.msra.mxu0 %v1062_v7 }
   0xd   :  { %899 = vmatprep.subr.bf16.mxu0 %v989_v5 }
   0xe   :  { %872 = vmatmul.mubr.bf16.vlgmr.msra.gmra.mrb[4].mxu1 %v991_v8 }
   0xf   :  { %876 = vmatpush3.bf16.msra.mxu1 %v1053_v6  ;;  %879 = vmatprep.mubr.msk.bf16.mxu1 %vm990_vm1, %v989_v5 }
  0x10   :  { %877 = vmatprep.subr.bf16.mxu1 %v989_v5 }
  0x13   :  { %878 = vmatpush3.bf16.msra.mxu1 %v1062_v7 }
  0x14   :  { %891 = vmatprep.subr.bf16.mxu1 %v989_v5 }
  0xd9   :  { %v861_v10 = vpop.f32.mrb[0].mxu0  ;;  %v865_v11 = vpop.f32.mrb[0].mxu1 }
  0xda   :  { %v125_v12 = vadd.f32 %v861_v10, %v796_v9  ;;  %v141_v13 = vadd.f32 %v865_v11, %v796_v9  ;;  %v116_v14 = vpop.f32.mrb[1].mxu0  ;;  %v132_v15 = vpop.f32.mrb[1].mxu1 }
  0xdb   :  { %v117_v16 = vadd.f32 %v796_v9, %v116_v14  ;;  %v133_v17 = vadd.f32 %v796_v9, %v132_v15  ;;  %v862_v18 = vpop.f32.mrb[2].mxu0  ;;  %v866_v19 = vpop.f32.mrb[2].mxu1 }
  0xdc   :  { %150 = vst.msk [vmem:[#allocation2 + $0x10] sm:$0xff] %vm147_vm2, %v125_v12  ;;  %154 = vst.msk [vmem:[#allocation2 + $0x30] sm:$0xff] %vm147_vm2, %v141_v13  ;;  %v128_v20 = vadd.f32 %v862_v18, %v796_v9  ;;  %v144_v21 = vadd.f32 %v866_v19, %v796_v9  ;;  %v119_v22 = vpop.f32.mrb[3].mxu0  ;;  %v135_v23 = vpop.f32.mrb[3].mxu1 }
  0xdd   :  { %148 = vst.msk [vmem:[#allocation2] sm:$0xff] %vm147_vm2, %v117_v16  ;;  %152 = vst.msk [vmem:[#allocation2 + $0x20] sm:$0xff] %vm147_vm2, %v133_v17  ;;  %v120_v24 = vadd.f32 %v796_v9, %v119_v22  ;;  %v136_v25 = vadd.f32 %v796_v9, %v135_v23 }
  0xde   :  { %151 = vst.msk [vmem:[#allocation2 + $0x18] sm:$0xff] %vm147_vm2, %v128_v20  ;;  %155 = vst.msk [vmem:[#allocation2 + $0x38] sm:$0xff] %vm147_vm2, %v144_v21 }
  0xdf   :  { %149 = vst.msk [vmem:[#allocation2 + $0x8] sm:$0xff] %vm147_vm2, %v120_v24  ;;  %153 = vst.msk [vmem:[#allocation2 + $0x28] sm:$0xff] %vm147_vm2, %v136_v25 }
  0xe1   :  { %v210_v26 = vpop.f32.mrb[4].mxu1 }
  0xe2   :  { %v873_v27 = vpop.f32.mrb[5].mxu1 }
  0xe3   :  { %v213_v28 = vpop.f32.mrb[6].mxu1  ;;  %v269_v42 = vld [vmem:[#allocation2 + $0x10] sm:$0xff] }
  0xe4   :  { %v160_v29 = vld [vmem:[#allocation2] sm:$0xff]  ;;  %v874_v30 = vpop.f32.mrb[7].mxu1  ;;  %v465_v21 = vld [vmem:[#allocation2 + $0x30] sm:$0xff] }
  0xe5   :  { %v216_v31 = vadd.f32 %v210_v26, %v160_v29  ;;  %v318_v50 = vld [vmem:[#allocation2 + $0x18] sm:$0xff]  ;;  %v367_v58 = vld [vmem:[#allocation2 + $0x20] sm:$0xff] }
  0xe6   :  { %v220_v34 = vld [vmem:[#allocation2 + $0x8] sm:$0xff]  ;;  %v815_v29 = vld [vmem:[%s1277_s5] ss:$0 sm:$0xff] }
  0xe7   :  { %v217_v32 = vmax.f32 %v216_v31, 0.0  ;;  %v416_v3 = vld [vmem:[#allocation2 + $0x28] sm:$0xff] }
  0xe9   :  { %218 = vst.msk [vmem:[#allocation2] sm:$0xff] %vm147_vm2, %v217_v32  ;;  %v221_v33 = vpack.c.bf16 %v217_v32, %v217_v32 }
  0xeb   :  { %880 = vmatmul.mubr.msk.bf16.vlgmr.msra.gmra.mrb[8].mxu1 %vm147_vm2, %v221_v33 }
  0xec   :  { %892 = vmatpush3.bf16.msra.mxu1 %v1053_v6  ;;  %895 = vmatprep.mubr.msk.bf16.mxu1 %vm990_vm1, %v989_v5 }
  0xed   :  { %893 = vmatprep.subr.bf16.mxu1 %v989_v5 }
  0xf0   :  { %894 = vmatpush3.bf16.msra.mxu1 %v1062_v7  ;;  %v563_v14 = vld [vmem:[#allocation2] sm:$0xff] }
  0xf1   :  { %907 = vmatprep.subr.bf16.mxu1 %v989_v5 }
 0x1be   :  { %v259_v35 = vpop.f32.mrb[8].mxu1 }
 0x1bf   :  { %v265_v36 = vadd.f32 %v259_v35, %v220_v34  ;;  %v881_v37 = vpop.f32.mrb[9].mxu1 }
 0x1c0   :  { %v262_v38 = vpop.f32.mrb[10].mxu1 }
 0x1c1   :  { %v266_v39 = vmax.f32 %v265_v36, 0.0  ;;  %v882_v40 = vpop.f32.mrb[11].mxu1 }
 0x1c3   :  { %267 = vst.msk [vmem:[#allocation2 + $0x8] sm:$0xff] %vm147_vm2, %v266_v39  ;;  %v270_v41 = vpack.c.bf16 %v266_v39, %v266_v39 }
 0x1c5   :  { %888 = vmatmul.mubr.msk.bf16.vlgmr.msra.gmra.mrb[4].mxu0 %vm147_vm2, %v270_v41 }
 0x1c6   :  { %900 = vmatpush3.bf16.msra.mxu0 %v1053_v6  ;;  %903 = vmatprep.mubr.msk.bf16.mxu0 %vm990_vm1, %v989_v5 }
 0x1c7   :  { %901 = vmatprep.subr.bf16.mxu0 %v989_v5 }
 0x1ca   :  { %902 = vmatpush3.bf16.msra.mxu0 %v1062_v7 }
 0x1cb   :  { %915 = vmatprep.subr.bf16.mxu0 %v989_v5 }
 0x298   :  { %v308_v43 = vpop.f32.mrb[4].mxu0 }
 0x299   :  { %v314_v44 = vadd.f32 %v308_v43, %v269_v42  ;;  %v889_v45 = vpop.f32.mrb[5].mxu0  ;;  %v514_v42 = vld [vmem:[#allocation2 + $0x38] sm:$0xff] }
 0x29a   :  { %v311_v46 = vpop.f32.mrb[6].mxu0 }
 0x29b   :  { %v315_v47 = vmax.f32 %v314_v44, 0.0  ;;  %v890_v48 = vpop.f32.mrb[7].mxu0 }
 0x29d   :  { %316 = vst.msk [vmem:[#allocation2 + $0x10] sm:$0xff] %vm147_vm2, %v315_v47  ;;  %v319_v49 = vpack.c.bf16 %v315_v47, %v315_v47 }
 0x29f   :  { %896 = vmatmul.mubr.msk.bf16.vlgmr.msra.gmra.mrb[12].mxu1 %vm147_vm2, %v319_v49 }
 0x2a0   :  { %908 = vmatpush3.bf16.msra.mxu1 %v1053_v6  ;;  %911 = vmatprep.mubr.msk.bf16.mxu1 %vm990_vm1, %v989_v5 }
 0x2a1   :  { %909 = vmatprep.subr.bf16.mxu1 %v989_v5 }
 0x2a4   :  { %910 = vmatpush3.bf16.msra.mxu1 %v1062_v7  ;;  %v565_v16 = vld [vmem:[#allocation2 + $0x10] sm:$0xff] }
 0x2a5   :  { %923 = vmatprep.subr.bf16.mxu1 %v989_v5 }
 0x372   :  { %v357_v51 = vpop.f32.mrb[12].mxu1 }
 0x373   :  { %v363_v52 = vadd.f32 %v357_v51, %v318_v50  ;;  %v897_v53 = vpop.f32.mrb[13].mxu1 }
 0x374   :  { %v360_v54 = vpop.f32.mrb[14].mxu1 }
 0x375   :  { %v364_v55 = vmax.f32 %v363_v52, 0.0  ;;  %v898_v56 = vpop.f32.mrb[15].mxu1 }
 0x377   :  { %365 = vst.msk [vmem:[#allocation2 + $0x18] sm:$0xff] %vm147_vm2, %v364_v55  ;;  %v368_v57 = vpack.c.bf16 %v364_v55, %v364_v55 }
 0x379   :  { %904 = vmatmul.mubr.msk.bf16.vlgmr.msra.gmra.mrb[8].mxu0 %vm147_vm2, %v368_v57 }
 0x37a   :  { %916 = vmatpush3.bf16.msra.mxu0 %v1053_v6  ;;  %919 = vmatprep.mubr.msk.bf16.mxu0 %vm990_vm1, %v989_v5 }
 0x37b   :  { %917 = vmatprep.subr.bf16.mxu0 %v989_v5 }
 0x37e   :  { %918 = vmatpush3.bf16.msra.mxu0 %v1062_v7  ;;  %v566_v15 = vld [vmem:[#allocation2 + $0x18] sm:$0xff] }
 0x37f   :  { %931 = vmatprep.subr.bf16.mxu0 %v955_v2  ;;  %v572_v19 = vpack.c.bf16 %v566_v15, %v565_v16 }
 0x44c   :  { %v406_v59 = vpop.f32.mrb[8].mxu0 }
 0x44d   :  { %v412_v60 = vadd.f32 %v406_v59, %v367_v58  ;;  %v905_v61 = vpop.f32.mrb[9].mxu0 }
 0x44e   :  { %v409_v62 = vpop.f32.mrb[10].mxu0 }
 0x44f   :  { %v413_v63 = vmax.f32 %v412_v60, 0.0  ;;  %v906_v0 = vpop.f32.mrb[11].mxu0 }
 0x451   :  { %414 = vst.msk [vmem:[#allocation2 + $0x20] sm:$0xff] %vm147_vm2, %v413_v63  ;;  %v417_v1 = vpack.c.bf16 %v413_v63, %v413_v63 }
 0x453   :  { %912 = vmatmul.mubr.msk.bf16.vlgmr.msra.gmra.mrb[16].mxu1 %vm147_vm2, %v417_v1 }
 0x454   :  { %924 = vmatpush3.bf16.msra.mxu1 %v1053_v6  ;;  %927 = vmatprep.mubr.msk.bf16.mxu1 %vm990_vm1, %v989_v5  ;;  %v564_v6 = vld [vmem:[#allocation2 + $0x8] sm:$0xff] }
 0x455   :  { %925 = vmatprep.subr.bf16.mxu1 %v989_v5  ;;  %v956_v5 = vld [vmem:[%s1276_s4 + $0x8] sm:$0xff]  }
 0x458   :  { %926 = vmatpush3.bf16.msra.mxu1 %v1062_v7  ;;  %v571_v7 = vpack.c.bf16 %v564_v6, %v563_v14  ;;  %v567_v17 = vld [vmem:[#allocation2 + $0x20] sm:$0xff] }
 0x526   :  { %v455_v4 = vpop.f32.mrb[16].mxu1 }
 0x527   :  { %v461_v8 = vadd.f32 %v455_v4, %v416_v3  ;;  %v913_v9 = vpop.f32.mrb[17].mxu1 }
 0x528   :  { %v458_v10 = vpop.f32.mrb[18].mxu1 }
 0x529   :  { %v462_v11 = vmax.f32 %v461_v8, 0.0  ;;  %v914_v12 = vpop.f32.mrb[19].mxu1 }
 0x52b   :  { %463 = vst.msk [vmem:[#allocation2 + $0x28] sm:$0xff] %vm147_vm2, %v462_v11  ;;  %v466_v13 = vpack.c.bf16 %v462_v11, %v462_v11 }
 0x52d   :  { %920 = vmatmul.mubr.msk.bf16.vlgmr.msra.gmra.mrb[12].mxu0 %vm147_vm2, %v466_v13 }
 0x52e   :  { %932 = vmatpush3.bf16.msra.mxu0 %v955_v2  ;;  %935 = vmatprep.mubr.msk.bf16.mxu0 %vm147_vm2, %v571_v7 }
 0x52f   :  { %933 = vmatprep.subr.bf16.mxu0 %v956_v5 }
 0x532   :  { %934 = vmatpush3.bf16.msra.mxu0 %v956_v5  ;;  %v568_v18 = vld [vmem:[#allocation2 + $0x28] sm:$0xff] }
 0x533   :  { %v573_v20 = vpack.c.bf16 %v568_v18, %v567_v17 }
 0x535   :  { %936 = vmatmul.mubr.msk.bf16.vlgmr.msra.gmra.mrb[16].mxu0 %vm147_vm2, %v572_v19 }
 0x536   :  { %939 = vmatprep.mubr.msk.bf16.mxu0 %vm147_vm2, %v573_v20 }
 0x600   :  { %v504_v22 = vpop.f32.mrb[12].mxu0 }
 0x601   :  { %v510_v23 = vadd.f32 %v504_v22, %v465_v21  ;;  %v921_v24 = vpop.f32.mrb[13].mxu0 }
 0x602   :  { %v507_v25 = vpop.f32.mrb[14].mxu0 }
 0x603   :  { %v511_v26 = vmax.f32 %v510_v23, 0.0  ;;  %v922_v27 = vpop.f32.mrb[15].mxu0 }
 0x605   :  { %512 = vst.msk [vmem:[#allocation2 + $0x30] sm:$0xff] %vm147_vm2, %v511_v26  ;;  %v515_v28 = vpack.c.bf16 %v511_v26, %v511_v26 }
 0x607   :  { %928 = vmatmul.mubr.msk.bf16.vlgmr.msra.gmra.mrb[20].mxu1 %vm147_vm2, %v515_v28 }
 0x608   :  { %v937_v30 = vpop.f32.mrb[16].mxu0 }
 0x609   :  { %v1146_v31 = vadd.f32 %v937_v30, %v815_v29  ;;  %v644_v32 = vpop.f32.mrb[17].mxu0 }
 0x60a   :  { %v1148_v33 = vadd.f32 %v815_v29, %v644_v32  ;;  %v938_v34 = vpop.f32.mrb[18].mxu0 }
 0x60b   :  { %v1150_v35 = vadd.f32 %v938_v34, %v815_v29  ;;  %v647_v36 = vpop.f32.mrb[19].mxu0  ;;  %v682_v37 = vsel %vm675_vm3, %v1146_v31, -inf }
 0x60c   :  { %v1154_v38 = vadd.f32 %v815_v29, %v647_v36  ;;  %683 = vmax.xlane.f32.xlu1 %v682_v37  ;;  %v676_v39 = vsel %vm675_vm3, %v1148_v33, -inf  ;;  %v569_v49 = vld [vmem:[#allocation2 + $0x30] sm:$0xff] }
 0x60d   :  { %677 = vmax.xlane.f32.xlu0 %v676_v39  ;;  %v685_v40 = vsel %vm675_vm3, %v1150_v35, -inf }
 0x60e   :  { %v679_v41 = vsel %vm675_vm3, %v1154_v38, -inf }
 0x610   :  { %686 = vmax.xlane.f32.xlu1 %v685_v40 }
 0x611   :  { %680 = vmax.xlane.f32.xlu0 %v679_v41 }
 0x699   :  { %v1170_v53 = vpop.xlane.xlu1 %683 }
 0x69a   :  { %v1168_v52 = vpop.xlane.xlu0 %677  ;;  %v702_v58 = vsub.f32 %v1146_v31, %v1170_v53 }
 0x69b   :  { %v700_v55 = vsub.f32 %v1148_v33, %v1168_v52 }
 0x69c   :  { %v712_v62 = vmul.f32 1.442695, %v702_v58 }
 0x69d   :  { %v1178_v57 = vpop.xlane.xlu1 %686  ;;  %v708_v59 = vmul.f32 1.442695, %v700_v55 }
 0x69e   :  { %v1172_v54 = vpop.xlane.xlu0 %680  ;;  %v703_v60 = vsub.f32 %v1150_v35, %v1178_v57 }
 0x69f   :  { %v701_v56 = vsub.f32 %v1154_v38, %v1172_v54  ;;  %957 = vpow2.f32 %v708_v59 }
 0x6a0   :  { %v714_v0 = vmul.f32 1.442695, %v703_v60 }
 0x6a1   :  { %v710_v61 = vmul.f32 1.442695, %v701_v56 }
 0x6a3   :  { %959 = vpow2.f32 %v710_v61 }
 0x6a4   :  { %961 = vpow2.f32 %v712_v62 }
 0x6a5   :  { %963 = vpow2.f32 %v714_v0 }
 0x6a9   :  { %v958_v13 = vpop.eup %957 }
 0x6aa   :  { %v724_v7 = vsel %vm675_vm3, %v958_v13, 0.0 }
 0x6ad   :  { %v960_v5 = vpop.eup %959 }
 0x6ae   :  { %v962_v15 = vpop.eup %961  ;;  %v727_v16 = vsel %vm675_vm3, %v960_v5, 0.0 }
 0x6af   :  { %v964_v17 = vpop.eup %963  ;;  %v730_v18 = vsel %vm675_vm3, %v962_v15, 0.0 }
 0x6b0   :  { %v733_v19 = vsel %vm675_vm3, %v964_v17, 0.0 }
 0x6da   :  { %v553_v43 = vpop.f32.mrb[20].mxu1 }
 0x6db   :  { %v559_v44 = vadd.f32 %v553_v43, %v514_v42  ;;  %v929_v45 = vpop.f32.mrb[21].mxu1 }
 0x6dc   :  { %v556_v46 = vpop.f32.mrb[22].mxu1 }
 0x6dd   :  { %v560_v47 = vmax.f32 %v559_v44, 0.0  ;;  %v930_v48 = vpop.f32.mrb[23].mxu1 }
 0x6df   :  { %561 = vst.msk [vmem:[#allocation2 + $0x38] sm:$0xff] %vm147_vm2, %v560_v47  ;;  %562 = vst.msk [vmem:[%s1278_s7] sm:$0xff] %vm147_vm2, %v560_v47 }
 0x6e6   :  { %v570_v50 = vld [vmem:[#allocation2 + $0x38] sm:$0xff] }
 0x6e7   :  { %v574_v51 = vpack.c.bf16 %v570_v50, %v569_v49 }
 0x6e9   :  { %940 = vmatmul.mubr.msk.bf16.gmra.mrb[20].mxu0 %vm147_vm2, %v574_v51 }
 0x7bc   :  { %v941_v63 = vpop.f32.mrb[20].mxu0 }
 0x7bd   :  { %v660_v1 = vpop.f32.mrb[21].mxu0  ;;  %v1186_v8 = vadd.f32 %v941_v63, %v815_v29 }
 0x7be   :  { %v1184_v2 = vadd.f32 %v815_v29, %v660_v1  ;;  %v942_v3 = vpop.f32.mrb[22].mxu0 }
 0x7bf   :  { %v663_v4 = vpop.f32.mrb[23].mxu0  ;;  %v1192_v11 = vadd.f32 %v942_v3, %v815_v29  ;;  %v694_v6 = vsel %vm675_vm3, %v1186_v8, -inf }
 0x7c0   :  { %v1188_v9 = vadd.f32 %v815_v29, %v663_v4  ;;  %v688_v10 = vsel %vm675_vm3, %v1184_v2, -inf }
 0x7c1   :  { %689 = vmax.xlane.f32.xlu0 %v688_v10  ;;  %v697_v14 = vsel %vm675_vm3, %v1192_v11, -inf }
 0x7c2   :  { %v691_v12 = vsel %vm675_vm3, %v1188_v9, -inf }
 0x7c3   :  { %692 = vmax.xlane.f32.xlu1 %v691_v12 }
 0x7c5   :  { %695 = vmax.xlane.f32.xlu0 %v694_v6 }
 0x7c7   :  { %698 = vmax.xlane.f32.xlu1 %v697_v14 }
 0x7c9   :  { %725 = vadd.xlane.f32.xlu0 %v724_v7 }
 0x7cb   :  { %728 = vadd.xlane.f32.xlu1 %v727_v16 }
 0x7cd   :  { %731 = vadd.xlane.f32.xlu0 %v730_v18 }
 0x7cf   :  { %734 = vadd.xlane.f32.xlu1 %v733_v19 }
 0x84e   :  { %v1204_v20 = vpop.xlane.xlu0 %689 }
 0x84f   :  { %v704_v21 = vsub.f32 %v1184_v2, %v1204_v20 }
 0x850   :  { %v1208_v22 = vpop.xlane.xlu1 %692 }
 0x851   :  { %v716_v23 = vmul.f32 1.442695, %v704_v21  ;;  %v705_v24 = vsub.f32 %v1188_v9, %v1208_v22 }
 0x852   :  { %v1212_v25 = vpop.xlane.xlu0 %695 }
 0x853   :  { %965 = vpow2.f32 %v716_v23  ;;  %v718_v26 = vmul.f32 1.442695, %v705_v24  ;;  %v706_v27 = vsub.f32 %v1186_v8, %v1212_v25 }
 0x854   :  { %v1216_v28 = vpop.xlane.xlu1 %698 }
 0x855   :  { %967 = vpow2.f32 %v718_v26  ;;  %v720_v29 = vmul.f32 1.442695, %v706_v27  ;;  %v707_v30 = vsub.f32 %v1192_v11, %v1216_v28 }
 0x856   :  { %v726_v32 = vpop.xlane.xlu0 %725 }
 0x857   :  { %969 = vpow2.f32 %v720_v29  ;;  %v722_v34 = vmul.f32 1.442695, %v707_v30 }
 0x858   :  { %971 = vlog2.f32 %v726_v32  ;;  %v729_v36 = vpop.xlane.xlu1 %728 }
 0x859   :  { %973 = vpow2.f32 %v722_v34 }
 0x85a   :  { %975 = vlog2.f32 %v729_v36  ;;  %v732_v37 = vpop.xlane.xlu0 %731 }
 0x85b   :  { %977 = vlog2.f32 %v732_v37 }
 0x85c   :  { %v735_v39 = vpop.xlane.xlu1 %734 }
 0x85d   :  { %v966_v40 = vpop.eup %965  ;;  %979 = vlog2.f32 %v735_v39 }
 0x85e   :  { %v736_v41 = vsel %vm675_vm3, %v966_v40, 0.0 }
 0x85f   :  { %v968_v42 = vpop.eup %967  ;;  %737 = vadd.xlane.f32.xlu0 %v736_v41 }
 0x860   :  { %v739_v43 = vsel %vm675_vm3, %v968_v42, 0.0 }
 0x861   :  { %v970_v44 = vpop.eup %969  ;;  %740 = vadd.xlane.f32.xlu1 %v739_v43 }
 0x862   :  { %v972_v45 = vpop.eup %971  ;;  %v742_v46 = vsel %vm675_vm3, %v970_v44, 0.0 }
 0x863   :  { %v974_v47 = vpop.eup %973  ;;  %v749_v48 = vmul.f32 0.6931472, %v972_v45  ;;  %743 = vadd.xlane.f32.xlu0 %v742_v46 }
 0x864   :  { %v976_v49 = vpop.eup %975  ;;  %v745_v50 = vsel %vm675_vm3, %v974_v47, 0.0 }
 0x865   :  { %v978_v51 = vpop.eup %977  ;;  %v764_v55 = vadd.f32 %v749_v48, %v1168_v52  ;;  %v751_v56 = vmul.f32 0.6931472, %v976_v49  ;;  %746 = vadd.xlane.f32.xlu1 %v745_v50 }
 0x866   :  { %v753_v58 = vmul.f32 0.6931472, %v978_v51 }
 0x867   :  { %v980_v59 = vpop.eup %979  ;;  %v772_v60 = vsub.f32 %v1148_v33, %v764_v55  ;;  %v765_v61 = vadd.f32 %v751_v56, %v1172_v54 }
 0x868   :  { %v766_v62 = vadd.f32 %v753_v58, %v1170_v53  ;;  %v755_v63 = vmul.f32 0.6931472, %v980_v59 }
 0x869   :  { %780 = vst.msk [vmem:[%s1279_s6] sm:$0xff] %vm675_vm3, %v772_v60  ;;  %v773_v0 = vsub.f32 %v1154_v38, %v765_v61 }
 0x86a   :  { %v774_v52 = vsub.f32 %v1146_v31, %v766_v62  ;;  %v767_v1 = vadd.f32 %v755_v63, %v1178_v57 }
 0x86b   :  { %781 = vst.msk [vmem:[%s1279_s6 + $0x8] sm:$0xff] %vm675_vm3, %v773_v0 }
 0x86c   :  { %782 = vst.msk [vmem:[%s1279_s6 + $0x10] sm:$0xff] %vm675_vm3, %v774_v52  ;;  %v775_v33 = vsub.f32 %v1150_v35, %v767_v1 }
 0x86e   :  { %783 = vst.msk [vmem:[%s1279_s6 + $0x18] sm:$0xff] %vm675_vm3, %v775_v33 }
 0x8ec   :  { %v738_v31 = vpop.xlane.xlu0 %737 }
 0x8ed   :  { %981 = vlog2.f32 %v738_v31 }
 0x8ee   :  { %v741_v38 = vpop.xlane.xlu1 %740 }
 0x8ef   :  { %983 = vlog2.f32 %v741_v38 }
 0x8f0   :  { %v744_v53 = vpop.xlane.xlu0 %743 }
 0x8f1   :  { %985 = vlog2.f32 %v744_v53 }
 0x8f2   :  { %v747_v54 = vpop.xlane.xlu1 %746 }
 0x8f3   :  { %987 = vlog2.f32 %v747_v54 }
 0x8f7   :  { %v982_v57 = vpop.eup %981 }
 0x8f8   :  { %v757_v3 = vmul.f32 0.6931472, %v982_v57 }
 0x8f9   :  { %v984_v4 = vpop.eup %983 }
 0x8fa   :  { %v768_v10 = vadd.f32 %v757_v3, %v1204_v20  ;;  %v759_v12 = vmul.f32 0.6931472, %v984_v4 }
 0x8fb   :  { %v986_v35 = vpop.eup %985 }
 0x8fc   :  { %v776_v6 = vsub.f32 %v1184_v2, %v768_v10  ;;  %v769_v13 = vadd.f32 %v759_v12, %v1208_v22  ;;  %v761_v14 = vmul.f32 0.6931472, %v986_v35 }
 0x8fd   :  { %v988_v5 = vpop.eup %987 }
 0x8fe   :  { %784 = vst.msk [vmem:[%s1279_s6 + $0x20] sm:$0xff] %vm675_vm3, %v776_v6  ;;  %v777_v7 = vsub.f32 %v1188_v9, %v769_v13  ;;  %v770_v15 = vadd.f32 %v761_v14, %v1212_v25  ;;  %v763_v16 = vmul.f32 0.6931472, %v988_v5 }
 0x900   :  { %785 = vst.msk [vmem:[%s1279_s6 + $0x28] sm:$0xff] %vm675_vm3, %v777_v7  ;;  %v778_v2 = vsub.f32 %v1186_v8, %v770_v15  ;;  %v771_v17 = vadd.f32 %v763_v16, %v1216_v28 }
 0x902   :  { %786 = vst.msk [vmem:[%s1279_s6 + $0x30] sm:$0xff] %vm675_vm3, %v778_v2  ;;  %v779_v18 = vsub.f32 %v1192_v11, %v771_v17 }
 0x904   :  { %787 = vst.msk [vmem:[%s1279_s6 + $0x38] sm:$0xff] %vm675_vm3, %v779_v18 }

</bundles_post_ra>
